<compile_context>
chip_gen: v7x
topology: tpu7x:2x2x1
jax: 0.10.0
libtpu: 0.0.40
codegen_flags: <defaults>
</compile_context>

<pallas_src>
import functools

import jax
import jax.numpy as jnp
from jax import lax
from jax.experimental import pallas as pl
from jax.experimental.pallas import tpu as pltpu


# -----------------------------------------------------------------------------
# Fused multi-head-attention kernel: one grid step = one batch element.
# -----------------------------------------------------------------------------
def _mha_kernel(x_ref, wqkv_ref, bqkv_ref, wout_ref, bout_ref, o_ref,
                *, num_heads, d_internal, compute_dtype):
    S = x_ref.shape[1]
    D = x_ref.shape[2]
    H, d_int = num_heads, d_internal
    Hd = H * d_int

    x = x_ref[0].astype(compute_dtype)                       # (S, D)

    # One wide projection for all heads' Q, K, V (f32 accumulate on the MXU).
    # The 1/sqrt(d_k) scale is already folded into the Q columns of W/b.
    qkv = jnp.dot(x, wqkv_ref[...].astype(compute_dtype),
                  preferred_element_type=jnp.float32)
    qkv = qkv + bqkv_ref[...]                                 # (S, 3*H*d_int) f32

    # Additive causal-mask bias, built once and reused for every head.
    row = lax.broadcasted_iota(jnp.int32, (S, S), 0)
    col = lax.broadcasted_iota(jnp.int32, (S, S), 1)
    mask_bias = jnp.where(col > row, jnp.float32(-1e30), jnp.float32(0.0))

    approx = compute_dtype == jnp.bfloat16

    acc = jnp.zeros((S, D), jnp.float32)
    for h in range(H):                                        # static, H is small
        q = qkv[:, h * d_int:(h + 1) * d_int]                 # (S, d_int) f32
        k = qkv[:, Hd + h * d_int:Hd + (h + 1) * d_int]
        v = qkv[:, 2 * Hd + h * d_int:2 * Hd + (h + 1) * d_int]

        # q @ k^T without materializing a transposed copy of k.
        s = lax.dot_general(q.astype(compute_dtype), k.astype(compute_dtype),
                            (((1,), (1,)), ((), ())),
                            preferred_element_type=jnp.float32)      # (S, S)
        s = s + mask_bias

        m = jnp.max(s, axis=-1, keepdims=True)
        p = jnp.exp(s - m)
        denom = jnp.sum(p, axis=-1, keepdims=True)
        attn = p * pl.reciprocal(denom, approx=approx)

        ctx = jnp.dot(attn.astype(compute_dtype), v.astype(compute_dtype),
                      preferred_element_type=jnp.float32)            # (S, d_int)

        # Fused (w0[h] @ w1-slice): projects straight into the d_model output.
        acc = acc + jnp.dot(ctx.astype(compute_dtype),
                            wout_ref[h].astype(compute_dtype),
                            preferred_element_type=jnp.float32)      # (S, D)

    o_ref[0] = (acc + bout_ref[...]).astype(o_ref.dtype)


# -----------------------------------------------------------------------------
# Parameter packing / weight fusion (tiny one-off XLA work in the wrapper).
# -----------------------------------------------------------------------------
def _prepare_params(params, compute_dtype):
    wq, bq = params["wq"], params["bq"]            # (H, D, d_int), (H, 1, d_int)
    wk, bk = params["wk"], params["bk"]
    wv, bv = params["wv"], params["bv"]
    w0, b0 = params["w0"], params["b0"]            # (H, d_int, d_head), (H, 1, d_head)
    w1, b1 = params["w1"], params["b1"]            # (D, D), (1, D)

    H, D, d_int = wq.shape
    d_head = w0.shape[-1]
    scale = jnp.float32(d_int) ** -0.5

    def heads_to_wide(w):                          # (H, D, d_int) -> (D, H*d_int)
        return jnp.transpose(w, (1, 0, 2)).reshape(D, H * d_int)

    def heads_to_wide_b(b):                        # (H, 1, d_int) -> (1, H*d_int)
        return jnp.transpose(b, (1, 0, 2)).reshape(1, H * d_int)

    # [ scaled-Q block | K block | V block ], heads concatenated inside each block.
    w_qkv = jnp.concatenate(
        [heads_to_wide(wq) * scale, heads_to_wide(wk), heads_to_wide(wv)], axis=-1)
    b_qkv = jnp.concatenate(
        [heads_to_wide_b(bq) * scale, heads_to_wide_b(bk), heads_to_wide_b(bv)],
        axis=-1)

    # Fold linear1 into the per-head output projections:
    #   out = sum_h logit_h @ (w0[h] @ w1[h*dh:(h+1)*dh, :])
    #         + (sum_h b0[h] @ w1[h*dh:(h+1)*dh, :] + b1)
    w1_r = w1.reshape(H, d_head, D)
    w_out = jnp.einsum("hik,hkd->hid", w0, w1_r)                     # (H, d_int, D)
    b_out = jnp.einsum("hk,hkd->d", b0[:, 0, :], w1_r)[None, :] + b1  # (1, D)

    return (w_qkv.astype(compute_dtype),
            b_qkv.astype(jnp.float32),
            w_out.astype(compute_dtype),
            b_out.astype(jnp.float32))


# -----------------------------------------------------------------------------
# Full module forward: a single pallas_call over the batch.
# -----------------------------------------------------------------------------
def multi_head_attention(x, params, *, compute_dtype=jnp.float32):
    B, S, D = x.shape
    H, _, d_int = params["wq"].shape
    w_qkv, b_qkv, w_out, b_out = _prepare_params(params, compute_dtype)

    kernel = functools.partial(_mha_kernel, num_heads=H, d_internal=d_int,
                               compute_dtype=compute_dtype)

    return pl.pallas_call(
        kernel,
        out_shape=jax.ShapeDtypeStruct((B, S, D), jnp.float32),
        grid_spec=pltpu.PrefetchScalarGridSpec(
            num_scalar_prefetch=0,
            grid=(B,),
            in_specs=[
                pl.BlockSpec((1, S, D), lambda b: (b, 0, 0)),            # x
                pl.BlockSpec((D, 3 * H * d_int), lambda b: (0, 0)),      # W_qkv
                pl.BlockSpec((1, 3 * H * d_int), lambda b: (0, 0)),      # b_qkv
                pl.BlockSpec((H, d_int, D), lambda b: (0, 0, 0)),        # W_out
                pl.BlockSpec((1, D), lambda b: (0, 0)),                  # b_out
            ],
            out_specs=pl.BlockSpec((1, S, D), lambda b: (b, 0, 0)),
        ),
        compiler_params=pltpu.CompilerParams(
            dimension_semantics=("parallel",),
            vmem_limit_bytes=32 * 1024 * 1024,
        ),
    )(x, w_qkv, b_qkv, w_out, b_out)


# -----------------------------------------------------------------------------
# Deterministic parameter init (nn.Linear-style uniform(-1/sqrt(fan_in), ..));
# weights stored as (in, out) so the math is x @ W + b.
# -----------------------------------------------------------------------------
def init_params(key, seq_length, d_model, num_heads, d_internal):
    d_head = d_model // num_heads
    ks = jax.random.split(key, 10)

    def u(k, shape, fan_in):
        bound = 1.0 / (fan_in ** 0.5)
        return jax.random.uniform(k, shape, jnp.float32, -bound, bound)

    H = num_heads
    return {
        "wq": u(ks[0], (H, d_model, d_internal), d_model),
        "bq": u(ks[1], (H, 1, d_internal), d_model),
        "wk": u(ks[2], (H, d_model, d_internal), d_model),
        "bk": u(ks[3], (H, 1, d_internal), d_model),
        "wv": u(ks[4], (H, d_model, d_internal), d_model),
        "bv": u(ks[5], (H, 1, d_internal), d_model),
        "w0": u(ks[6], (H, d_internal, d_head), d_internal),
        "b0": u(ks[7], (H, 1, d_head), d_internal),
        "w1": u(ks[8], (d_model, d_model), d_model),
        "b1": u(ks[9], (1, d_model), d_model),
    }


# -----------------------------------------------------------------------------
# Pure-JAX reference (mirrors the PyTorch forward exactly) for verification.
# -----------------------------------------------------------------------------
def reference(x, params, seq_length):
    H = params["wq"].shape[0]
    tril = jnp.tril(jnp.ones((seq_length, seq_length)))
    outs = []
    for h in range(H):
        q = x @ params["wq"][h] + params["bq"][h, 0]
        k = x @ params["wk"][h] + params["bk"][h, 0]
        v = x @ params["wv"][h] + params["bv"][h, 0]
        d_k = k.shape[-1]
        w = jnp.einsum("bqd,bkd->bqk", q, k) * d_k ** (-0.5)
        w = jnp.where(tril == 0, -jnp.inf, w)
        a = jax.nn.softmax(w, axis=-1)
        logit = jnp.einsum("bqk,bkd->bqd", a, v)
        outs.append(logit @ params["w0"][h] + params["b0"][h, 0])
    cat = jnp.concatenate(outs, axis=-1)
    return cat @ params["w1"] + params["b1"][0]


if __name__ == "__main__":
    batch, seq_length, d_model, num_heads, d_internal = 2, 8, 32, 4, 16

    key = jax.random.PRNGKey(0)
    k_x, k_p = jax.random.split(key)
    x = jax.random.normal(k_x, (batch, seq_length, d_model), jnp.float32)
    params = init_params(k_p, seq_length, d_model, num_heads, d_internal)

    ref = reference(x, params, seq_length)

    # f32 path: strict correctness check.
    out = jax.block_until_ready(multi_head_attention(x, params))
    assert out.shape == (batch, seq_length, d_model)
    assert jnp.allclose(out, ref, atol=1e-4, rtol=1e-4), "fp32 kernel mismatch"

    # bf16-operand / f32-accumulate path (v6e / v7x MXU-native): loose check.
    out_bf16 = jax.block_until_ready(
        multi_head_attention(x, params, compute_dtype=jnp.bfloat16))
    rel = jnp.linalg.norm(out_bf16 - ref) / jnp.linalg.norm(ref)
    assert bool(jnp.isfinite(rel)) and float(rel) < 0.1, "bf16 kernel diverged"

    print("KERNEL_OK")
</pallas_src>

<mosaic_0001>
module attributes {stable_mosaic.version = 11 : i64} {
  func.func @_mha_kernel(%arg0: i32, %arg1: memref<1x8x32xf32, #tpu.memory_space<vmem>>, %arg2: memref<32x192xf32, #tpu.memory_space<vmem>>, %arg3: memref<1x192xf32, #tpu.memory_space<vmem>>, %arg4: memref<4x16x32xf32, #tpu.memory_space<vmem>>, %arg5: memref<1x32xf32, #tpu.memory_space<vmem>>, %arg6: memref<1x8x32xf32, #tpu.memory_space<vmem>>) attributes {dimension_semantics = [#tpu.dimension_semantics<parallel>], iteration_bounds = array<i64: 2>, scalar_prefetch = 0 : i64, scratch_operands = 0 : i64, tpu.core_type = #tpu.core_type<tc>, window_params = [{transform_indices = @transform_0, window_bounds = array<i64: 1, 8, 32>}, {pipeline_mode = #tpu.pipeline_mode<synchronous>, transform_indices = @transform_1, window_bounds = array<i64: 32, 192>}, {pipeline_mode = #tpu.pipeline_mode<synchronous>, transform_indices = @transform_2, window_bounds = array<i64: 1, 192>}, {pipeline_mode = #tpu.pipeline_mode<synchronous>, transform_indices = @transform_3, window_bounds = array<i64: 4, 16, 32>}, {pipeline_mode = #tpu.pipeline_mode<synchronous>, transform_indices = @transform_4, window_bounds = array<i64: 1, 32>}, {transform_indices = @transform_5, window_bounds = array<i64: 1, 8, 32>}]} {
    %c0 = arith.constant 0 : index
    %c0_0 = arith.constant 0 : index
    %c0_1 = arith.constant 0 : index
    %0 = vector.load %arg1[%c0, %c0_0, %c0_1] : memref<1x8x32xf32, #tpu.memory_space<vmem>>, vector<1x8x32xf32>
    %1 = vector.shape_cast %0 : vector<1x8x32xf32> to vector<8x32xf32>
    %c0_2 = arith.constant 0 : index
    %c0_3 = arith.constant 0 : index
    %2 = vector.load %arg2[%c0_2, %c0_3] : memref<32x192xf32, #tpu.memory_space<vmem>>, vector<32x192xf32>
    %cst = arith.constant dense<0.000000e+00> : vector<8x192xf32>
    %3 = tpu.matmul %1, %2, %cst {dimension_numbers = #tpu.dot_dimension_numbers<[1], [0], [0], [1], [0, 0, 1, 1], [], []>} : vector<8x32xf32>, vector<32x192xf32>, vector<8x192xf32> -> vector<8x192xf32>
    %c0_4 = arith.constant 0 : index
    %c0_5 = arith.constant 0 : index
    %4 = vector.load %arg3[%c0_4, %c0_5] : memref<1x192xf32, #tpu.memory_space<vmem>>, vector<1x192xf32>
    %5 = vector.broadcast %4 : vector<1x192xf32> to vector<8x192xf32>
    %6 = arith.addf %3, %5 : vector<8x192xf32>
    %7 = tpu.iota {dimensions = array<i32: 0>} : vector<8x8xi32>
    %8 = tpu.iota {dimensions = array<i32: 1>} : vector<8x8xi32>
    %9 = arith.cmpi sgt, %8, %7 : vector<8x8xi32>
    %cst_6 = arith.constant -1.000000e+30 : f32
    %cst_7 = arith.constant 0.000000e+00 : f32
    %10 = vector.broadcast %cst_6 : f32 to vector<8x8xf32>
    %11 = vector.broadcast %cst_7 : f32 to vector<8x8xf32>
    %12 = arith.select %9, %10, %11 : vector<8x8xi1>, vector<8x8xf32>
    %cst_8 = arith.constant 0.000000e+00 : f32
    %13 = vector.broadcast %cst_8 : f32 to vector<8x32xf32>
    %14 = vector.extract_strided_slice %6 {offsets = [0, 0], sizes = [8, 16], strides = [1, 1]} : vector<8x192xf32> to vector<8x16xf32>
    %15 = vector.extract_strided_slice %6 {offsets = [0, 64], sizes = [8, 16], strides = [1, 1]} : vector<8x192xf32> to vector<8x16xf32>
    %16 = vector.extract_strided_slice %6 {offsets = [0, 128], sizes = [8, 16], strides = [1, 1]} : vector<8x192xf32> to vector<8x16xf32>
    %cst_9 = arith.constant dense<0.000000e+00> : vector<8x8xf32>
    %17 = tpu.matmul %14, %15, %cst_9 {dimension_numbers = #tpu.dot_dimension_numbers<[1], [1], [0], [0], [0, 0, 1, 0], [], []>} : vector<8x16xf32>, vector<8x16xf32>, vector<8x8xf32> -> vector<8x8xf32>
    %18 = arith.addf %17, %12 : vector<8x8xf32>
    %cst_10 = arith.constant dense<0xFF800000> : vector<8xf32>
    %19 = vector.multi_reduction <maximumf>, %18, %cst_10 [1] : vector<8x8xf32> to vector<8xf32>
    %20 = vector.shape_cast %19 : vector<8xf32> to vector<8x1xf32>
    %21 = vector.broadcast %20 : vector<8x1xf32> to vector<8x8xf32>
    %22 = arith.subf %18, %21 : vector<8x8xf32>
    %23 = math.exp %22 : vector<8x8xf32>
    %cst_11 = arith.constant dense<0.000000e+00> : vector<8xf32>
    %24 = vector.multi_reduction <add>, %23, %cst_11 [1] : vector<8x8xf32> to vector<8xf32>
    %25 = vector.shape_cast %24 : vector<8xf32> to vector<8x1xf32>
    %26 = tpu.reciprocal %25 : vector<8x1xf32> -> vector<8x1xf32>
    %27 = vector.broadcast %26 : vector<8x1xf32> to vector<8x8xf32>
    %28 = arith.mulf %23, %27 : vector<8x8xf32>
    %cst_12 = arith.constant dense<0.000000e+00> : vector<8x16xf32>
    %29 = tpu.matmul %28, %16, %cst_12 {dimension_numbers = #tpu.dot_dimension_numbers<[1], [0], [0], [1], [0, 0, 1, 1], [], []>} : vector<8x8xf32>, vector<8x16xf32>, vector<8x16xf32> -> vector<8x16xf32>
    %c0_13 = arith.constant 0 : index
    %c0_14 = arith.constant 0 : index
    %c0_15 = arith.constant 0 : index
    %30 = vector.load %arg4[%c0_13, %c0_14, %c0_15] : memref<4x16x32xf32, #tpu.memory_space<vmem>>, vector<1x16x32xf32>
    %31 = vector.shape_cast %30 : vector<1x16x32xf32> to vector<16x32xf32>
    %cst_16 = arith.constant dense<0.000000e+00> : vector<8x32xf32>
    %32 = tpu.matmul %29, %31, %cst_16 {dimension_numbers = #tpu.dot_dimension_numbers<[1], [0], [0], [1], [0, 0, 1, 1], [], []>} : vector<8x16xf32>, vector<16x32xf32>, vector<8x32xf32> -> vector<8x32xf32>
    %33 = arith.addf %13, %32 : vector<8x32xf32>
    %34 = vector.extract_strided_slice %6 {offsets = [0, 16], sizes = [8, 16], strides = [1, 1]} : vector<8x192xf32> to vector<8x16xf32>
    %35 = vector.extract_strided_slice %6 {offsets = [0, 80], sizes = [8, 16], strides = [1, 1]} : vector<8x192xf32> to vector<8x16xf32>
    %36 = vector.extract_strided_slice %6 {offsets = [0, 144], sizes = [8, 16], strides = [1, 1]} : vector<8x192xf32> to vector<8x16xf32>
    %cst_17 = arith.constant dense<0.000000e+00> : vector<8x8xf32>
    %37 = tpu.matmul %34, %35, %cst_17 {dimension_numbers = #tpu.dot_dimension_numbers<[1], [1], [0], [0], [0, 0, 1, 0], [], []>} : vector<8x16xf32>, vector<8x16xf32>, vector<8x8xf32> -> vector<8x8xf32>
    %38 = arith.addf %37, %12 : vector<8x8xf32>
    %cst_18 = arith.constant dense<0xFF800000> : vector<8xf32>
    %39 = vector.multi_reduction <maximumf>, %38, %cst_18 [1] : vector<8x8xf32> to vector<8xf32>
    %40 = vector.shape_cast %39 : vector<8xf32> to vector<8x1xf32>
    %41 = vector.broadcast %40 : vector<8x1xf32> to vector<8x8xf32>
    %42 = arith.subf %38, %41 : vector<8x8xf32>
    %43 = math.exp %42 : vector<8x8xf32>
    %cst_19 = arith.constant dense<0.000000e+00> : vector<8xf32>
    %44 = vector.multi_reduction <add>, %43, %cst_19 [1] : vector<8x8xf32> to vector<8xf32>
    %45 = vector.shape_cast %44 : vector<8xf32> to vector<8x1xf32>
    %46 = tpu.reciprocal %45 : vector<8x1xf32> -> vector<8x1xf32>
    %47 = vector.broadcast %46 : vector<8x1xf32> to vector<8x8xf32>
    %48 = arith.mulf %43, %47 : vector<8x8xf32>
    %cst_20 = arith.constant dense<0.000000e+00> : vector<8x16xf32>
    %49 = tpu.matmul %48, %36, %cst_20 {dimension_numbers = #tpu.dot_dimension_numbers<[1], [0], [0], [1], [0, 0, 1, 1], [], []>} : vector<8x8xf32>, vector<8x16xf32>, vector<8x16xf32> -> vector<8x16xf32>
    %c1 = arith.constant 1 : index
    %c0_21 = arith.constant 0 : index
    %c0_22 = arith.constant 0 : index
    %50 = vector.load %arg4[%c1, %c0_21, %c0_22] : memref<4x16x32xf32, #tpu.memory_space<vmem>>, vector<1x16x32xf32>
    %51 = vector.shape_cast %50 : vector<1x16x32xf32> to vector<16x32xf32>
    %cst_23 = arith.constant dense<0.000000e+00> : vector<8x32xf32>
    %52 = tpu.matmul %49, %51, %cst_23 {dimension_numbers = #tpu.dot_dimension_numbers<[1], [0], [0], [1], [0, 0, 1, 1], [], []>} : vector<8x16xf32>, vector<16x32xf32>, vector<8x32xf32> -> vector<8x32xf32>
    %53 = arith.addf %33, %52 : vector<8x32xf32>
    %54 = vector.extract_strided_slice %6 {offsets = [0, 32], sizes = [8, 16], strides = [1, 1]} : vector<8x192xf32> to vector<8x16xf32>
    %55 = vector.extract_strided_slice %6 {offsets = [0, 96], sizes = [8, 16], strides = [1, 1]} : vector<8x192xf32> to vector<8x16xf32>
    %56 = vector.extract_strided_slice %6 {offsets = [0, 160], sizes = [8, 16], strides = [1, 1]} : vector<8x192xf32> to vector<8x16xf32>
    %cst_24 = arith.constant dense<0.000000e+00> : vector<8x8xf32>
    %57 = tpu.matmul %54, %55, %cst_24 {dimension_numbers = #tpu.dot_dimension_numbers<[1], [1], [0], [0], [0, 0, 1, 0], [], []>} : vector<8x16xf32>, vector<8x16xf32>, vector<8x8xf32> -> vector<8x8xf32>
    %58 = arith.addf %57, %12 : vector<8x8xf32>
    %cst_25 = arith.constant dense<0xFF800000> : vector<8xf32>
    %59 = vector.multi_reduction <maximumf>, %58, %cst_25 [1] : vector<8x8xf32> to vector<8xf32>
    %60 = vector.shape_cast %59 : vector<8xf32> to vector<8x1xf32>
    %61 = vector.broadcast %60 : vector<8x1xf32> to vector<8x8xf32>
    %62 = arith.subf %58, %61 : vector<8x8xf32>
    %63 = math.exp %62 : vector<8x8xf32>
    %cst_26 = arith.constant dense<0.000000e+00> : vector<8xf32>
    %64 = vector.multi_reduction <add>, %63, %cst_26 [1] : vector<8x8xf32> to vector<8xf32>
    %65 = vector.shape_cast %64 : vector<8xf32> to vector<8x1xf32>
    %66 = tpu.reciprocal %65 : vector<8x1xf32> -> vector<8x1xf32>
    %67 = vector.broadcast %66 : vector<8x1xf32> to vector<8x8xf32>
    %68 = arith.mulf %63, %67 : vector<8x8xf32>
    %cst_27 = arith.constant dense<0.000000e+00> : vector<8x16xf32>
    %69 = tpu.matmul %68, %56, %cst_27 {dimension_numbers = #tpu.dot_dimension_numbers<[1], [0], [0], [1], [0, 0, 1, 1], [], []>} : vector<8x8xf32>, vector<8x16xf32>, vector<8x16xf32> -> vector<8x16xf32>
    %c2 = arith.constant 2 : index
    %c0_28 = arith.constant 0 : index
    %c0_29 = arith.constant 0 : index
    %70 = vector.load %arg4[%c2, %c0_28, %c0_29] : memref<4x16x32xf32, #tpu.memory_space<vmem>>, vector<1x16x32xf32>
    %71 = vector.shape_cast %70 : vector<1x16x32xf32> to vector<16x32xf32>
    %cst_30 = arith.constant dense<0.000000e+00> : vector<8x32xf32>
    %72 = tpu.matmul %69, %71, %cst_30 {dimension_numbers = #tpu.dot_dimension_numbers<[1], [0], [0], [1], [0, 0, 1, 1], [], []>} : vector<8x16xf32>, vector<16x32xf32>, vector<8x32xf32> -> vector<8x32xf32>
    %73 = arith.addf %53, %72 : vector<8x32xf32>
    %74 = vector.extract_strided_slice %6 {offsets = [0, 48], sizes = [8, 16], strides = [1, 1]} : vector<8x192xf32> to vector<8x16xf32>
    %75 = vector.extract_strided_slice %6 {offsets = [0, 112], sizes = [8, 16], strides = [1, 1]} : vector<8x192xf32> to vector<8x16xf32>
    %76 = vector.extract_strided_slice %6 {offsets = [0, 176], sizes = [8, 16], strides = [1, 1]} : vector<8x192xf32> to vector<8x16xf32>
    %cst_31 = arith.constant dense<0.000000e+00> : vector<8x8xf32>
    %77 = tpu.matmul %74, %75, %cst_31 {dimension_numbers = #tpu.dot_dimension_numbers<[1], [1], [0], [0], [0, 0, 1, 0], [], []>} : vector<8x16xf32>, vector<8x16xf32>, vector<8x8xf32> -> vector<8x8xf32>
    %78 = arith.addf %77, %12 : vector<8x8xf32>
    %cst_32 = arith.constant dense<0xFF800000> : vector<8xf32>
    %79 = vector.multi_reduction <maximumf>, %78, %cst_32 [1] : vector<8x8xf32> to vector<8xf32>
    %80 = vector.shape_cast %79 : vector<8xf32> to vector<8x1xf32>
    %81 = vector.broadcast %80 : vector<8x1xf32> to vector<8x8xf32>
    %82 = arith.subf %78, %81 : vector<8x8xf32>
    %83 = math.exp %82 : vector<8x8xf32>
    %cst_33 = arith.constant dense<0.000000e+00> : vector<8xf32>
    %84 = vector.multi_reduction <add>, %83, %cst_33 [1] : vector<8x8xf32> to vector<8xf32>
    %85 = vector.shape_cast %84 : vector<8xf32> to vector<8x1xf32>
    %86 = tpu.reciprocal %85 : vector<8x1xf32> -> vector<8x1xf32>
    %87 = vector.broadcast %86 : vector<8x1xf32> to vector<8x8xf32>
    %88 = arith.mulf %83, %87 : vector<8x8xf32>
    %cst_34 = arith.constant dense<0.000000e+00> : vector<8x16xf32>
    %89 = tpu.matmul %88, %76, %cst_34 {dimension_numbers = #tpu.dot_dimension_numbers<[1], [0], [0], [1], [0, 0, 1, 1], [], []>} : vector<8x8xf32>, vector<8x16xf32>, vector<8x16xf32> -> vector<8x16xf32>
    %c3 = arith.constant 3 : index
    %c0_35 = arith.constant 0 : index
    %c0_36 = arith.constant 0 : index
    %90 = vector.load %arg4[%c3, %c0_35, %c0_36] : memref<4x16x32xf32, #tpu.memory_space<vmem>>, vector<1x16x32xf32>
    %91 = vector.shape_cast %90 : vector<1x16x32xf32> to vector<16x32xf32>
    %cst_37 = arith.constant dense<0.000000e+00> : vector<8x32xf32>
    %92 = tpu.matmul %89, %91, %cst_37 {dimension_numbers = #tpu.dot_dimension_numbers<[1], [0], [0], [1], [0, 0, 1, 1], [], []>} : vector<8x16xf32>, vector<16x32xf32>, vector<8x32xf32> -> vector<8x32xf32>
    %93 = arith.addf %73, %92 : vector<8x32xf32>
    %c0_38 = arith.constant 0 : index
    %c0_39 = arith.constant 0 : index
    %94 = vector.load %arg5[%c0_38, %c0_39] : memref<1x32xf32, #tpu.memory_space<vmem>>, vector<1x32xf32>
    %95 = vector.broadcast %94 : vector<1x32xf32> to vector<8x32xf32>
    %96 = arith.addf %93, %95 : vector<8x32xf32>
    %c0_40 = arith.constant 0 : index
    %c0_41 = arith.constant 0 : index
    %c0_42 = arith.constant 0 : index
    %97 = vector.load %arg6[%c0_40, %c0_41, %c0_42] : memref<1x8x32xf32, #tpu.memory_space<vmem>>, vector<1x8x32xf32>
    %98 = vector.shape_cast %97 : vector<1x8x32xf32> to vector<8x32xf32>
    %99 = vector.shape_cast %96 : vector<8x32xf32> to vector<1x8x32xf32>
    tpu.vector_store %arg6[%c0_40, %c0_41, %c0_42], %99 {strides = array<i32>} : memref<1x8x32xf32, #tpu.memory_space<vmem>>, vector<1x8x32xf32>,
    return
  }
  func.func @transform_0(%arg0: i32) -> (i32, i32, i32) {
    %c0_i32 = arith.constant 0 : i32
    %c0_i32_0 = arith.constant 0 : i32
    %c0_i32_1 = arith.constant 0 : i32
    return %arg0, %c0_i32, %c0_i32_0 : i32, i32, i32
  }
  func.func @transform_1(%arg0: i32) -> (i32, i32) {
    %c0_i32 = arith.constant 0 : i32
    %c0_i32_0 = arith.constant 0 : i32
    %c0_i32_1 = arith.constant 0 : i32
    return %c0_i32, %c0_i32_0 : i32, i32
  }
  func.func @transform_2(%arg0: i32) -> (i32, i32) {
    %c0_i32 = arith.constant 0 : i32
    %c0_i32_0 = arith.constant 0 : i32
    %c0_i32_1 = arith.constant 0 : i32
    return %c0_i32, %c0_i32_0 : i32, i32
  }
  func.func @transform_3(%arg0: i32) -> (i32, i32, i32) {
    %c0_i32 = arith.constant 0 : i32
    %c0_i32_0 = arith.constant 0 : i32
    %c0_i32_1 = arith.constant 0 : i32
    %c0_i32_2 = arith.constant 0 : i32
    return %c0_i32, %c0_i32_0, %c0_i32_1 : i32, i32, i32
  }
  func.func @transform_4(%arg0: i32) -> (i32, i32) {
    %c0_i32 = arith.constant 0 : i32
    %c0_i32_0 = arith.constant 0 : i32
    %c0_i32_1 = arith.constant 0 : i32
    return %c0_i32, %c0_i32_0 : i32, i32
  }
  func.func @transform_5(%arg0: i32) -> (i32, i32, i32) {
    %c0_i32 = arith.constant 0 : i32
    %c0_i32_0 = arith.constant 0 : i32
    %c0_i32_1 = arith.constant 0 : i32
    return %arg0, %c0_i32, %c0_i32_0 : i32, i32, i32
  }
}

</mosaic_0001>

<bundles_post_ra>
// kernel: tpu_custom_call.1
= control target key start
LH: loop header
LB: loop body
LE: loop exit
PB: predicated region body
PF: predicated region fallthrough
CT: control target
= control target key end

     0   :  { %10 = vsyncpa [#allocation3], 0  ;;  %s2231_s0 = inlined_call_operand.hbm [shape: f32[2,8,32], index: 0, kind: input, shape index: {}]   ;;  %s2232_s1 = inlined_call_operand.hbm [shape: f32[32,192], index: 1, kind: input, shape index: {}]   ;;  %s2233_s2 = inlined_call_operand.vmem [shape: f32[1,192], index: 2, kind: input, shape index: {}]   ;;  %s2234_s3 = inlined_call_operand.hbm [shape: f32[4,16,32], index: 3, kind: input, shape index: {}]   ;;  %s2235_s4 = inlined_call_operand.vmem [shape: f32[1,32], index: 4, kind: input, shape index: {}]   ;;  %s2236_s5 = inlined_call_operand.hbm [shape: f32[2,8,32], index: 5, kind: output, shape index: {}]  }
   0x1   :  { %12 = vsyncpa [#allocation3 + $0x1], 0 }
   0x2   :  { %13 = vsyncpa [#allocation6], 0 }
   0x3   :  { %14 = vsyncpa [#allocation4], 0 }
   0x4   :  { %16 = vsyncpa [#allocation4 + $0x1], 0  ;;  %s1900_s18 = smov 0   ;;  %s1902_s19 = smov 0  }
   0x5   :  { %s1904_s20 = smov 0   ;;  %s1906_s21 = smov 0  }
   0x6 LB: > { %s1921_s22 = sadd.s32 4294967295, %s1850_s21   ;;  %s1447_s23 = sadd.s32 4294967294, %s1850_s21   ;;  %s1850_s21 = sphi %s1906_s21, %s2256_s21   ;;  %s1846_s20 = sphi %s1904_s20, %s2255_s20   ;;  %s1842_s19 = sphi %s1902_s19, %s2254_s19   ;;  %s1838_s18 = sphi %s1900_s18, %s2253_s18  }
   0x7   : > { %p42_p0 = scmp.ne.s32.totalorder %s1842_s19, %s1838_s18  ;;  %p2237_p1 = scmp.eq.s32.totalorder %s1921_s22, 0 }
   0x8   : > { %p156_p3 = scmp.eq.s32.totalorder %s1447_s23, 1  ;;  %p1448_p5 = scmp.ge.s32.totalorder %s1850_s21, 1 }
   0x9   : > { %p1930_p4 = por %p2237_p1, %p42_p0  ;;  %p163_p7 = scmp.lt.s32.totalorder %s1850_s21, 3 }
   0xa   : > { %p1935_p6 = por %p156_p3, %p42_p0  ;;  %s1852_s27 = smov [#allocation5]  }
   0xb   : > { %s2240_s24 = scalar_select %p1930_p4, 1, 0 }
   0xc   : > { %s2241_s25 = scalar_select %p1935_p6, 1, 0 }
   0xd   : > { %p1940_p8 = pnand %p1448_p5, %p163_p7  ;;  %s175_s28 = sshll.u32 %s1852_s27, 4  ;;  %s1944_s28 = int_to_ptr.vmem [resolvable:$true] %s175_s28 }
   0xe   : > { %s1853_s30 = smov [#allocation7]   ;;  %s1694_s9 = scalar_lea.hbm %s2232_s1, 1024 }
   0xf   : > { %p1609_p9 = pneg %p1940_p8  ;;  %s191_s6 = sshll.u32 %s1853_s30, 4  ;;  %s1955_s6 = int_to_ptr.vmem [resolvable:$true] %s191_s6 }
  0x10   : > { %p1695_p12 = scmp.ne.s32.totalorder %s2232_s1, %s1694_s9  ;;  %p1701_p5 = scmp.lt.u32.totalorder %s1694_s9, %s2232_s1 }
  0x11   : > { %p1951_p11 = pnand %p1609_p9, %p2237_p1 }
  0x13   : > { %p1696_p13 = pneg %p1951_p11 }
  0x15   : > { %p1697_p0 = pnand %p1696_p13, %p1695_p12 }
  0x17   : > { %p1698_p3 = pneg %p1697_p0 }
  0x19   : > { %p1703_p7 = pnand %p1701_p5, %p1698_p3 }
  0x1b   : > { %1706 = shalt.err (!%p1703_p7)
}
  0x1c   : > { %s1707_s14 = scalar_lea.vmem %s1944_s28, 1024  ;;  %p1715_p2 = scmp.lt.s32.totalorder %s1944_s28, %s1944_s28 }
  0x1d   : > { %p1708_p9 = scmp.ne.s32.totalorder %s1944_s28, %s1707_s14  ;;  %p1716_p12 = scmp.lt.s32.totalorder %s1707_s14, %s1707_s14 }
  0x1f   : > { %p1710_p10 = pnand %p1708_p9, %p1696_p13  ;;  %p1717_p0 = por %p1716_p12, %p1715_p2 }
  0x21   : > { %p1711_p1 = pneg %p1710_p10 }
  0x23   : > { %p1718_p6 = pnand %p1717_p0, %p1711_p1 }
  0x25   : > { %1721 = shalt.err (!%p1718_p6)
}
  0x26   : > { %s1854_s15 = smov 256   ;;  %s1855_s16 = smov 16  }
  0x27   : > { %1612 = dma.hbm_to_vmem [thread:$0]  (!%p1951_p11), %s2232_s1, 1024, %s1944_s28, [#allocation6], %s1854_s15, %s1854_s15, %s1855_s16  }
  0x28   : > { %s1722_s7 = scalar_lea.hbm %s2234_s3, 1024 }
  0x29   : > { %p1723_p2 = scmp.ne.s32.totalorder %s2234_s3, %s1722_s7  ;;  %p1729_p10 = scmp.lt.u32.totalorder %s1722_s7, %s2234_s3 }
  0x2b   : > { %p1725_p1 = pnand %p1723_p2, %p1696_p13 }
  0x2d   : > { %p1726_p6 = pneg %p1725_p1 }
  0x2f   : > { %p1731_p3 = pnand %p1729_p10, %p1726_p6 }
  0x31   : > { %1734 = shalt.err (!%p1731_p3)
}
  0x32   : > { %s1735_s28 = scalar_lea.vmem %s1955_s6, 1024  ;;  %p1743_p12 = scmp.lt.s32.totalorder %s1955_s6, %s1955_s6 }
  0x33   : > { %p1736_p5 = scmp.ne.s32.totalorder %s1955_s6, %s1735_s28  ;;  %p1744_p0 = scmp.lt.s32.totalorder %s1735_s28, %s1735_s28 }
  0x35   : > { %p1738_p7 = pnand %p1736_p5, %p1696_p13  ;;  %p1745_p2 = por %p1744_p0, %p1743_p12 }
  0x37   : > { %p1739_p9 = pneg %p1738_p7 }
  0x39   : > { %p1746_p1 = pnand %p1745_p2, %p1739_p9 }
  0x3b   : > { %1749 = shalt.err (!%p1746_p1)
}
  0x3c   : > { %s1856_s12 = smov 128   ;;  %s1857_s13 = smov 8  }
  0x3d   : > { %1615 = dma.hbm_to_vmem [thread:$0]  (!%p1951_p11), %s2234_s3, 1024, %s1955_s6, [#allocation6], %s1856_s12, %s1856_s12, %s1857_s13  }
  0x3e   : > { %s2010_s16 = sadd.s32 1, %s1850_s21   ;;  %s29_s23 = sadd.s32 1, %s1846_s20 }
  0x3f   : > { %s26_s17 = ssub.s32 %s1850_s21, %s2010_s16  ;;  %p36_p6 = scmp.ne.s32.totalorder %s1846_s20, %s1842_s19 }
  0x40   : > { %p27_p13 = scmp.eq.s32.totalorder %s26_s17, 0  ;;  %p37_p10 = scmp.eq.s32.totalorder %s1850_s21, 0 }
  0x41   : > { %p2244_p5 = scmp.eq.s32.totalorder %s1921_s22, 1  ;;  %p1626_p9 = scmp.lt.s32.totalorder %s1850_s21, 2 }
  0x42   : > { %s2019_s27 = scalar_select %p27_p13, %s1846_s20, %s29_s23  }
  0x43   : > { %p38_p3 = por %p37_p10, %p36_p6  ;;  %p2023_p7 = por %p2244_p5, %p36_p6 }
  0x44   : > { %s208_s29 = sand.u32 1, %s1846_s20   ;;  %s1453_s6 = sshll.u32 %s1850_s21, 7 }
  0x45   : > { %s2245_s30 = scalar_select %p2023_p7, 1, 0 }
  0x46   : > { %s1452_s7 = sshll.u32 %s208_s29, 3  ;;  %s2033_s10 = scalar_lea.hbm %s2231_s0, %s1453_s6 }
  0x47   : > { %s212_s11 = scalar_lea.vmem [#allocation2], %s1452_s7  ;;  %p2037_p11 = pnand %p1626_p9, %p38_p3 }
  0x48   : > { %s219_s28 = sshll.u32 %s212_s11, 4  ;;  %s209_s13 = scalar_lea.sflag [#allocation3], %s208_s29  ;;  %s2035_s28 = int_to_ptr.vmem [resolvable:$true] %s219_s28 }
  0x49   : > { %s1750_s14 = scalar_lea.hbm %s2033_s10, 128  ;;  %p1752_p0 = pneg %p2037_p11 }
  0x4a   : > { %p1751_p12 = scmp.ne.s32.totalorder %s2033_s10, %s1750_s14  ;;  %s1755_s23 = scalar_lea.hbm %s2231_s0, 256 }
  0x4b   : > { %p1756_p13 = scmp.lt.u32.totalorder %s2033_s10, %s2231_s0  ;;  %p1757_p6 = scmp.lt.u32.totalorder %s1755_s23, %s1750_s14 }
  0x4c   : > { %p1753_p2 = pnand %p1752_p0, %p1751_p12  ;;  %p1759_p3 = scmp.lt.u32.totalorder %s1750_s14, %s2033_s10 }
  0x4d   : > { %p1758_p10 = por %p1757_p6, %p1756_p13 }
  0x4e   : > { %p1754_p1 = pneg %p1753_p2 }
  0x4f   : > { %p1760_p5 = por %p1759_p3, %p1758_p10 }
  0x51   : > { %p1761_p9 = pnand %p1760_p5, %p1754_p1 }
  0x53   : > { %1764 = shalt.err (!%p1761_p9)
}
  0x54   : > { %s1765_s29 = scalar_lea.vmem %s2035_s28, 128  ;;  %s1858_s8 = smov [#allocation2]  }
  0x55   : > { %p1766_p12 = scmp.ne.s32.totalorder %s2035_s28, %s1765_s29  ;;  %s1770_s9 = sshll.u32 %s1858_s8, 4  ;;  %s1771_s9 = int_to_ptr.vmem [resolvable:$false] %s1770_s9 }
  0x56   : > { %s1772_s11 = scalar_lea.vmem %s1771_s9, 256  ;;  %p1773_p4 = scmp.lt.s32.totalorder %s2035_s28, %s1771_s9 }
  0x57   : > { %p1768_p2 = pnand %p1766_p12, %p1752_p0  ;;  %p1774_p13 = scmp.lt.s32.totalorder %s1772_s11, %s1765_s29 }
  0x59   : > { %p1769_p7 = pneg %p1768_p2  ;;  %p1775_p6 = por %p1774_p13, %p1773_p4 }
  0x5b   : > { %p1776_p10 = pnand %p1775_p6, %p1769_p7 }
  0x5d   : > { %1779 = shalt.err (!%p1776_p10)
}
  0x5e   : > { %1619 = dma.hbm_to_vmem [thread:$0]  (!%p2037_p11), %s2033_s10, 128, %s2035_s28, %s209_s13  }
  0x5f   : > { %228 = sbr.rel (%p1940_p8) target bundleno = 2699 (0xa8b), region = 40  ;;  %s2069_s14 = sand.u32 (!%p1940_p8), 1, %s1842_s19  }
  0x60   : > { %s1455_s15 = sshll.u32 (!%p1940_p8), %s2069_s14, 3  ;;  %s231_s17 = scalar_lea.sflag (!%p1940_p8), [#allocation3], %s2069_s14 }
  0x61   : > { %s234_s23 = scalar_lea.vmem (!%p1940_p8), [#allocation2], %s1455_s15  ;;  %p2247_p4 = scmp.ne.s32.totalorder (!%p1940_p8), %s2240_s24, 0 }
  0x66   : > { %1825 = dma.done.wait (%p2247_p4), %s231_s17, 128  }
  0x67   : > { %1827 = vsyncadd (%p2247_p4), %s231_s17, 4294967168  ;;  %p2248_p7 = scmp.eq.s32.totalorder %s1921_s22, 0 }
  0x69   : > { %1829 = dma.done.wait (%p2248_p7), [#allocation6], 2048   ;;  %p2249_p8 = pmov %p2248_p7 }
  0x6a   : > { %v1859_v0 = vmov 0.0   ;;  %v271_v1 = vld [vmem:[#allocation5 + $0x8] sm:$0xff]  ;;  %v273_v2 = vld [vmem:[#allocation5 + $0x18] sm:$0xff]  ;;  %v270_v3 = vld [vmem:[#allocation5] sm:$0xff]  ;;  %vm290_vm0 = vcmask 261120   ;;  %v280_v14 = vlaneseq  ;;  %vm1860_vm1 = vmmov 0  }
  0x6b   : > { %1831 = vsyncadd (%p2249_p8), [#allocation6], 4294965248  ;;  %358 = vmatprep.mubr.f32.mxu0 %v1859_v0  ;;  %1509 = vmatprep.subr.mxu1 %v1859_v0  ;;  %v1577_v4 = vpack.c.bf16 %v273_v2, %v271_v1  ;;  %v272_v5 = vld [vmem:[#allocation5 + $0x10] sm:$0xff]  ;;  %v275_v6 = vld [vmem:[#allocation5 + $0x28] sm:$0xff]  ;;  %s1861_s10 = smov 112   ;;  %s1862_s28 = smov 64  }
  0x6c   : > { %v277_v7 = vld [vmem:[#allocation5 + $0x38] sm:$0xff]  ;;  %v1579_v8 = vpack.c.bf16 %v272_v5, %v270_v3  ;;  %v274_v10 = vld [vmem:[#allocation5 + $0x20] sm:$0xff]  ;;  %v276_v11 = vld [vmem:[#allocation5 + $0x30] sm:$0xff]  ;;  %v281_v15 = vshrl.u32 %v280_v14, 7  ;;  %1511 = vmatprep.mubr.msk.f32.mxu1 %vm1860_vm1, %v1859_v0  ;;  %s1863_s12 = smov 48   ;;  %vm374_vm2 = vcmask 130048  }
  0x6d   : > { %v1581_v9 = vpack.c.bf16 %v277_v7, %v275_v6  ;;  %1578 = vmatprep.subr.bf16.mxu0 %v1577_v4  ;;  %v1583_v12 = vpack.c.bf16 %v276_v11, %v274_v10  ;;  %v269_v13 = vld [vmem:[%s234_s23] sm:$0xff]  ;;  %v368_v28 = vand.u32 127, %v280_v14  ;;  %vm449_vm4 = vcmask 64512   ;;  %s1864_s13 = smov 32   ;;  %s1865_s7 = smov 96   ;;  %v534_v56 = vld [vmem:[#allocation7] sm:$0xff] }
  0x6e   : > { %1580 = vmatpush1.bf16.msra.mxu0 %v1579_v8  ;;  %v282_v16 = vsub.s32 0, %v281_v15  ;;  %v278_v17 = vld [vmem:[%s2233_s2] sm:$0x3]  ;;  %v286_v22 = vsub.s32 1, %v281_v15  ;;  %v704_v49 = vld [vmem:[#allocation7 + $0x18] sm:$0xff]  ;;  %v1866_v50 = vmov 0.0|0.0  }
  0x6f   : > { %1582 = vmatprep.subr.bf16.mxu0 %v1581_v9  ;;  %vm369_vm3 = vcmp.gt.s32.totalorder %v368_v28, %v281_v15  ;;  %v703_v48 = vld [vmem:[#allocation7 + $0x10] sm:$0xff]  ;;  %v535_v57 = vld [vmem:[#allocation7 + $0x8] sm:$0xff]  ;;  %s1867_s6 = smov 80   ;;  %s1868_s29 = smov 16  }
  0x70   : > { %v283_v18 = vrot.slane %v278_v17, %v282_v16  ;;  %v287_v23 = vrot.slane %v278_v17, %v286_v22  ;;  %v2115_v29 = vsel %vm369_vm3, -1e+30, %v1859_v0  ;;  %v1586_v51 = vpack.c.bf16 %v704_v49, %v703_v48  ;;  %v1018_v22 = vld [vmem:[#allocation7 + $0x28] sm:$0xff]  ;;  %s1478_s11 = sshll.u32 %s1921_s22, 7  ;;  %s268_s17 = scalar_lea.vmem [#allocation8], %s1455_s15 }
  0x71   : > { %v1589_v60 = vpack.c.bf16 %v535_v57, %v534_v56  ;;  %s1358_s23 = sshll.u32 %s268_s17, 4  ;;  %p2250_p0 = scmp.ne.s32.totalorder %s2245_s30, 0  ;;  %s2188_s23 = int_to_ptr.vmem [resolvable:$true] %s1358_s23 }
  0x72   : > { %1584 = vmatpush1.bf16.msra.mxu0 %v1583_v12  ;;  %s1780_s22 = scalar_lea.vmem %s2188_s23, 128  ;;  %s1869_s15 = smov [#allocation8]  }
  0x73   : > { %1519 = vmatprep.subr.mxu0 %v1859_v0  ;;  %p1781_p11 = scmp.ne.s32.totalorder %s2188_s23, %s1780_s22 }
  0x75   : > { %1459 = vmatmul.mubr.msk.f32.vlgmr.msra.gmra.mrb[0].mxu0 %vm290_vm0, %v269_v13  ;;  %p1782_p1 = pnand %p1781_p11, %p2250_p0 }
  0x76   : > { %1521 = vmatprep.mubr.msk.f32.mxu0 %vm1860_vm1, %v1859_v0 }
  0x77   : > { %p1783_p3 = pneg %p1782_p1 }
 0x148   : > { %v360_v19 = vpop.f32.mrb[0].mxu0 }
 0x149   : > { %v2094_v20 = vadd.f32 %v360_v19, %v283_v18  ;;  %v362_v21 = vpop.f32.mrb[1].mxu0 }
 0x14a   : > { %v2102_v25 = vadd.f32 %v362_v21, %v287_v23  ;;  %v1017_v21 = vld [vmem:[#allocation7 + $0x20] sm:$0xff] }
 0x14b   : > { %536 = vrot.lane.b32.xlu1 %v2094_v20, %s1861_s10  ;;  %372 = vrot.lane.b32.xlu0 %v2094_v20, %s1862_s28  ;;  %v1592_v23 = vpack.c.bf16 %v1018_v22, %v1017_v21  ;;  %s1345_s28 = scalar_lea.sflag [#allocation4], %s2069_s14 }
 0x14f   : > { %538 = vrot.lane.b32.xlu0 %v2094_v20, %s1863_s12  ;;  %s1784_s12 = sshll.u32 %s1869_s15, 4  ;;  %s1785_s12 = int_to_ptr.vmem [resolvable:$false] %s1784_s12 }
 0x150   : > { %p1787_p5 = scmp.lt.s32.totalorder %s2188_s23, %s1785_s12 }
 0x1bd   : > { %v373_v24 = vpop.permute.xlu0 %372  ;;  %v537_v27 = vpop.permute.xlu1 %536 }
 0x1be   : > { %1510 = vmatpush3.xpose.msk.msra.mxu1 %vm374_vm2, %v373_v24 }
 0x1bf   : > { %1514 = vmatprep.subr.mxu1 %v1859_v0 }
 0x1c1   : > { %1512 = vmatmul.mubr.msk.f32.vlgmr.msra.gmra.mrb[0].mxu1 %vm374_vm2, %v2094_v20  ;;  %v539_v26 = vpop.permute.xlu0 %538 }
 0x1c2   : > { %1515 = vmatpush3.msra.mxu1 %v2102_v25  ;;  %1520 = vmatpush3.xpose.msk.msra.mxu0 %vm374_vm2, %v539_v26 }
 0x1c3   : > { %1516 = vmatprep.mubr.msk.f32.mxu1 %vm1860_vm1, %v1859_v0  ;;  %1524 = vmatprep.subr.mxu1 %v1859_v0 }
 0x1c4   : > { %1585 = vmatprep.subr.bf16.mxu0 %v1866_v50 }
 0x1c5   : > { %1522 = vmatmul.mubr.msk.f32.vlgmr.msra.gmra.mrb[2].mxu0 %vm374_vm2, %v537_v27 }
 0x1c6   : > { %1533 = vmatprep.mubr.msk.f32.mxu0 %vm1860_vm1, %v1859_v0  ;;  %1587 = vmatpush3.bf16.msra.mxu0 %v1586_v51  ;;  %v1476_v51 = vld [vmem:[%s2235_s4] ss:$0 sm:$0xff] }
 0x1c7   : > { %1543 = vmatprep.subr.mxu0 %v1859_v0 }
 0x294   : > { %v445_v30 = vpop.f32.mrb[0].mxu1 }
 0x295   : > { %v446_v31 = vadd.f32 %v445_v30, %v2115_v29  ;;  %v1513_v32 = vpop.f32.mrb[1].mxu1 }
 0x297   : > { %v450_v33 = vsel %vm449_vm4, %v446_v31, -inf }
 0x298   : > { %451 = vmax.xlane.f32.xlu1 %v450_v33  ;;  %v610_v34 = vpop.f32.mrb[2].mxu0 }
 0x299   : > { %v611_v35 = vadd.f32 %v610_v34, %v2115_v29  ;;  %v1523_v36 = vpop.f32.mrb[3].mxu0 }
 0x29b   : > { %v614_v37 = vsel %vm449_vm4, %v611_v35, -inf }
 0x29c   : > { %615 = vmax.xlane.f32.xlu0 %v614_v37 }
 0x325   : > { %v452_v38 = vpop.xlane.xlu1 %451 }
 0x326   : > { %v453_v39 = vsub.f32 %v446_v31, %v452_v38 }
 0x328   : > { %v454_v40 = vmul.f32 1.442695, %v453_v39 }
 0x329   : > { %v616_v41 = vpop.xlane.xlu0 %615 }
 0x32a   : > { %1678 = vpow2.f32 %v454_v40  ;;  %v617_v42 = vsub.f32 %v611_v35, %v616_v41  ;;  %v1259_v41 = vld [vmem:[#allocation7 + $0x30] sm:$0xff] }
 0x32c   : > { %v618_v43 = vmul.f32 1.442695, %v617_v42 }
 0x32e   : > { %1680 = vpow2.f32 %v618_v43 }
 0x334   : > { %v1679_v44 = vpop.eup %1678 }
 0x335   : > { %v456_v45 = vsel %vm449_vm4, %v1679_v44, 0.0 }
 0x336   : > { %457 = vadd.xlane.f32.xlu0 %v456_v45 }
 0x338   : > { %v1681_v46 = vpop.eup %1680 }
 0x339   : > { %v620_v47 = vsel %vm449_vm4, %v1681_v46, 0.0 }
 0x33a   : > { %621 = vadd.xlane.f32.xlu1 %v620_v47 }
 0x34b   : > { %853 = vrot.lane.b32.xlu1 %v2094_v20, %s1864_s13  ;;  %s1786_s13 = scalar_lea.vmem %s1785_s12, 256 }
 0x34c   : > { %626 = vrot.lane.b32.xlu0 %v2102_v25, %s1861_s10  ;;  %s2186_s10 = scalar_lea.hbm %s2236_s5, %s1478_s11  ;;  %p1788_p9 = scmp.lt.s32.totalorder %s1786_s13, %s1780_s22 }
 0x34e   : > { %p1789_p12 = por %p1788_p9, %p1787_p5 }
 0x34f   : > { %851 = vrot.lane.b32.xlu1 %v2094_v20, %s1865_s7 }
 0x350   : > { %p1790_p2 = pnand %p1789_p12, %p1783_p3 }
 0x3c3   : > { %v458_v52 = vpop.xlane.xlu0 %457 }
 0x3c4   : > { %1682 = vrcp.f32 %v458_v52 }
 0x3c7   : > { %v622_v53 = vpop.xlane.xlu1 %621  ;;  %v627_v58 = vpop.permute.xlu0 %626 }
 0x3c8   : > { %1684 = vrcp.f32 %v622_v53 }
 0x3cb   : > { %v854_v1 = vpop.permute.xlu1 %853 }
 0x3ce   : > { %v1683_v54 = vpop.eup %1682 }
 0x3cf   : > { %v460_v55 = vmul.f32 %v1683_v54, %v1679_v44  ;;  %v852_v4 = vpop.permute.xlu1 %851 }
 0x3d1   : > { %1517 = vmatmul.mubr.msk.f32.vlgmr.msra.gmra.mrb[2].mxu1 %vm449_vm4, %v460_v55 }
 0x3d2   : > { %v1685_v59 = vpop.eup %1684  ;;  %1525 = vmatpush3.msra.mxu1 %v627_v58  ;;  %1526 = vmatprep.mubr.msk.f32.mxu1 %vm1860_vm1, %v1859_v0 }
 0x3d3   : > { %v624_v61 = vmul.f32 %v1685_v59, %v1681_v46  ;;  %1588 = vmatprep.subr.bf16.mxu1 %v1866_v50 }
 0x3d5   : > { %1527 = vmatmul.mubr.msk.f32.vlgmr.msra.gmra.mrb[4].mxu1 %vm449_vm4, %v624_v61 }
 0x3d6   : > { %1590 = vmatpush3.bf16.msra.mxu1 %v1589_v60  ;;  %1540 = vmatprep.mubr.msk.f32.mxu1 %vm1860_vm1, %v1859_v0 }
 0x3d7   : > { %1548 = vmatprep.subr.mxu1 %v1859_v0 }
 0x4a4   : > { %v530_v62 = vpop.f32.mrb[2].mxu1 }
 0x4a5   : > { %v1518_v63 = vpop.f32.mrb[3].mxu1  ;;  %1541 = vmatmul.mubr.msk.f32.vlgmr.msra.gmra.mrb[6].mxu1 %vm374_vm2, %v530_v62 }
 0x4a6   : > { %1550 = vmatprep.mubr.msk.f32.mxu1 %vm1860_vm1, %v1859_v0 }
 0x4a8   : > { %v698_v2 = vpop.f32.mrb[4].mxu1 }
 0x4a9   : > { %v1528_v3 = vpop.f32.mrb[5].mxu1  ;;  %1534 = vmatmul.mubr.msk.f32.vlgmr.msra.gmra.mrb[4].mxu0 %vm374_vm2, %v698_v2 }
 0x4aa   : > { %1544 = vmatpush3.xpose.msk.msra.mxu0 %vm374_vm2, %v854_v1  ;;  %1545 = vmatprep.mubr.msk.f32.mxu0 %vm1860_vm1, %v1859_v0 }
 0x4ab   : > { %1591 = vmatprep.subr.bf16.mxu0 %v1866_v50 }
 0x4ad   : > { %1546 = vmatmul.mubr.msk.f32.vlgmr.msra.gmra.mrb[6].mxu0 %vm374_vm2, %v852_v4 }
 0x4ae   : > { %1557 = vmatprep.mubr.msk.f32.mxu0 %vm1860_vm1, %v1859_v0  ;;  %1593 = vmatpush3.bf16.msra.mxu0 %v1592_v23 }
 0x4af   : > { %1565 = vmatprep.subr.mxu0 %v1859_v0 }
 0x578   : > { %v847_v5 = vpop.f32.mrb[6].mxu1 }
 0x579   : > { %v1542_v6 = vpop.f32.mrb[7].mxu1 }
 0x57c   : > { %v774_v7 = vpop.f32.mrb[4].mxu0 }
 0x57d   : > { %v848_v8 = vadd.f32 %v847_v5, %v774_v7  ;;  %v1535_v9 = vpop.f32.mrb[5].mxu0 }
 0x580   : > { %v925_v10 = vpop.f32.mrb[6].mxu0 }
 0x581   : > { %v926_v11 = vadd.f32 %v925_v10, %v2115_v29  ;;  %v1547_v12 = vpop.f32.mrb[7].mxu0 }
 0x583   : > { %v929_v13 = vsel %vm449_vm4, %v926_v11, -inf }
 0x584   : > { %930 = vmax.xlane.f32.xlu0 %v929_v13 }
 0x59a   : > { %940 = vrot.lane.b32.xlu0 %v2102_v25, %s1865_s7 }
 0x59e   : > { %1093 = vrot.lane.b32.xlu0 %v2094_v20, %s1867_s6 }
 0x611   : > { %v931_v14 = vpop.xlane.xlu0 %930 }
 0x612   : > { %v932_v15 = vsub.f32 %v926_v11, %v931_v14 }
 0x614   : > { %v933_v16 = vmul.f32 1.442695, %v932_v15 }
 0x615   : > { %v941_v17 = vpop.permute.xlu0 %940 }
 0x616   : > { %1686 = vpow2.f32 %v933_v16  ;;  %1549 = vmatpush3.msra.mxu1 %v941_v17 }
 0x617   : > { %1560 = vmatprep.subr.mxu1 %v1859_v0 }
 0x620   : > { %v1687_v18 = vpop.eup %1686 }
 0x621   : > { %v935_v19 = vsel %vm449_vm4, %v1687_v18, 0.0 }
 0x622   : > { %936 = vadd.xlane.f32.xlu1 %v935_v19 }
 0x633   : > { %1095 = vrot.lane.b32.xlu1 %v2094_v20, %s1868_s29  ;;  %v1094_v20 = vpop.permute.xlu0 %1093 }
 0x6af   : > { %v937_v24 = vpop.xlane.xlu1 %936 }
 0x6b0   : > { %1688 = vrcp.f32 %v937_v24 }
 0x6b3   : > { %v1096_v28 = vpop.permute.xlu1 %1095 }
 0x6ba   : > { %v1689_v26 = vpop.eup %1688 }
 0x6bb   : > { %v939_v27 = vmul.f32 %v1689_v26, %v1687_v18 }
 0x6bd   : > { %1551 = vmatmul.mubr.msk.f32.vlgmr.msra.gmra.mrb[8].mxu1 %vm449_vm4, %v939_v27 }
 0x6be   : > { %1561 = vmatpush3.xpose.msk.msra.mxu1 %vm374_vm2, %v1096_v28  ;;  %1562 = vmatprep.mubr.msk.f32.mxu1 %vm1860_vm1, %v1859_v0 }
 0x6bf   : > { %1594 = vmatprep.subr.bf16.mxu1 %v1866_v50 }
 0x6c1   : > { %1563 = vmatmul.mubr.msk.f32.vlgmr.msra.gmra.mrb[10].mxu1 %vm374_vm2, %v1094_v20 }
 0x6c2   : > { %1574 = vmatprep.mubr.msk.f32.mxu1 %vm1860_vm1, %v1859_v0 }
 0x790   : > { %v1012_v30 = vpop.f32.mrb[8].mxu1 }
 0x791   : > { %v1552_v31 = vpop.f32.mrb[9].mxu1  ;;  %1558 = vmatmul.mubr.msk.f32.vlgmr.msra.gmra.mrb[8].mxu0 %vm374_vm2, %v1012_v30 }
 0x792   : > { %1567 = vmatprep.mubr.msk.f32.mxu0 %vm1860_vm1, %v1859_v0  ;;  %v1260_v0 = vld [vmem:[#allocation7 + $0x38] sm:$0xff] }
 0x793   : > { %v1595_v42 = vpack.c.bf16 %v1260_v0, %v1259_v41 }
 0x794   : > { %v1167_v32 = vpop.f32.mrb[10].mxu1 }
 0x795   : > { %v1168_v33 = vadd.f32 %v1167_v32, %v2115_v29  ;;  %v1564_v34 = vpop.f32.mrb[11].mxu1  ;;  %1596 = vmatpush3.bf16.msra.mxu1 %v1595_v42 }
 0x797   : > { %v1171_v35 = vsel %vm449_vm4, %v1168_v33, -inf }
 0x798   : > { %1172 = vmax.xlane.f32.xlu1 %v1171_v35 }
 0x825   : > { %v1173_v36 = vpop.xlane.xlu1 %1172 }
 0x826   : > { %v1174_v37 = vsub.f32 %v1168_v33, %v1173_v36 }
 0x828   : > { %v1175_v38 = vmul.f32 1.442695, %v1174_v37 }
 0x82a   : > { %1690 = vpow2.f32 %v1175_v38 }
 0x834   : > { %v1691_v39 = vpop.eup %1690 }
 0x835   : > { %v1177_v40 = vsel %vm449_vm4, %v1691_v39, 0.0 }
 0x836   : > { %1178 = vadd.xlane.f32.xlu0 %v1177_v40 }
 0x84c   : > { %1182 = vrot.lane.b32.xlu0 %v2102_v25, %s1867_s6 }
 0x864   : > { %v1088_v29 = vpop.f32.mrb[8].mxu0 }
 0x865   : > { %v1092_v43 = vadd.f32 %v1088_v29, %v848_v8  ;;  %v1559_v44 = vpop.f32.mrb[9].mxu0 }
 0x8c3   : > { %v1179_v45 = vpop.xlane.xlu0 %1178 }
 0x8c4   : > { %1692 = vrcp.f32 %v1179_v45 }
 0x8c7   : > { %v1183_v46 = vpop.permute.xlu0 %1182 }
 0x8c8   : > { %1566 = vmatpush3.msra.mxu0 %v1183_v46 }
 0x8ce   : > { %v1693_v47 = vpop.eup %1692 }
 0x8cf   : > { %v1181_v48 = vmul.f32 %v1693_v47, %v1691_v39 }
 0x8d1   : > { %1568 = vmatmul.mubr.msk.f32.vlgmr.msra.gmra.mrb[10].mxu0 %vm449_vm4, %v1181_v48 }
 0x9a4   : > { %v1254_v49 = vpop.f32.mrb[10].mxu0 }
 0x9a5   : > { %v1569_v25 = vpop.f32.mrb[11].mxu0  ;;  %1575 = vmatmul.mubr.msk.f32.vlgmr.msra.gmra.mrb[12].mxu1 %vm374_vm2, %v1254_v49 }
 0xa78   : > { %v1330_v50 = vpop.f32.mrb[12].mxu1 }
 0xa79   : > { %v1334_v52 = vadd.f32 %v1330_v50, %v1092_v43  ;;  %v1576_v53 = vpop.f32.mrb[13].mxu1 }
 0xa7b   : > { %v1342_v54 = vadd.f32 %v1476_v51, %v1334_v52 }
 0xa7d   : > { %1343 = vst.msk [vmem:[%s268_s17] sm:$0xff] %vm290_vm0, %v1342_v54 }
 0xa7e   : > { %1793 = shalt.err (!%p1790_p2)
}
 0xa7f   : > { %s1794_s14 = scalar_lea.hbm %s2186_s10, 128  ;;  %s1798_s29 = scalar_lea.hbm %s2236_s5, 256 }
 0xa80   : > { %p1795_p13 = scmp.ne.s32.totalorder %s2186_s10, %s1794_s14  ;;  %p1799_p4 = scmp.lt.u32.totalorder %s2186_s10, %s2236_s5 }
 0xa81   : > { %p1800_p7 = scmp.lt.u32.totalorder %s1798_s29, %s1794_s14  ;;  %p1802_p11 = scmp.lt.u32.totalorder %s1794_s14, %s2186_s10 }
 0xa82   : > { %p1796_p6 = pnand %p1795_p13, %p2250_p0 }
 0xa83   : > { %p1801_p8 = por %p1800_p7, %p1799_p4 }
 0xa84   : > { %p1797_p10 = pneg %p1796_p6 }
 0xa85   : > { %p1803_p1 = por %p1802_p11, %p1801_p8 }
 0xa87   : > { %p1804_p3 = pnand %p1803_p1, %p1797_p10 }
 0xa89   : > { %1807 = shalt.err (!%p1804_p3)
}
 0xa8a   : > { %1607 = dma.vmem_to_hbm [thread:$0]  (%p2250_p0), %s2188_s23, 128, %s2186_s10, %s1345_s28  }
 0xa8b PF: > { %s1370_s11 = sand.u32 1, %s1838_s18   ;;  %p2251_p5 = scmp.ne.s32.totalorder %s2241_s25, 0 }
 0xa8c   : > { %p2252_p9 = scmp.ge.s32.totalorder %s1850_s21, 2  ;;  %s1371_s17 = scalar_lea.sflag [#allocation4], %s1370_s11 }
 0xa8e   : > { %p1621_p12 = pnand %p2252_p9, %p2251_p5 }
 0xa90   : > { %1833 = dma.done.wait (!%p1621_p12), %s1371_s17, 128  }
 0xa91   : > { %1835 = vsyncadd (!%p1621_p12), %s1371_s17, 4294967168  ;;  %p19_p2 = scmp.ge.s32.totalorder %s2010_s16, 4   ;;  %s2253_s18 = smov %s1842_s19 }
 0xa92   : > { %s2254_s19 = smov %s1846_s20  ;;  %s2255_s20 = smov %s2019_s27 }
 0xa93   : > { %s2256_s21 = smov %s2010_s16  ;;  %21 = sbr.rel (!%p19_p2) target bundleno = 6 (0x6), region = 96 }
 0xa9a   :  { %1376 = vsyncpa [#allocation3], 1 }
 0xa9b   :  { %1378 = vsyncpa [#allocation3 + $0x1], 1 }
 0xa9c   :  { %1379 = vsyncpa [#allocation6], 1 }
 0xa9d   :  { %1380 = vsyncpa [#allocation4], 1 }
 0xa9e   :  { %1382 = vsyncpa [#allocation4 + $0x1], 1 }

</bundles_post_ra>
